<compile_context>
chip_gen: v5e
topology: v5e:2x2
jax: 0.10.0
libtpu: 0.0.40
codegen_flags: <defaults>
</compile_context>

<pallas_src>
import functools
import math

import jax
import jax.numpy as jnp
from jax.experimental import pallas as pl
from jax.experimental.pallas import tpu as pltpu


def _layernorm_kernel(alpha_ref, bias_ref, x_ref, o_ref, *, eps):
    """Unpacked path: one logical row per VMEM row; reduce over the lane axis."""
    x = x_ref[...].astype(jnp.float32)
    n = x.shape[-1]

    mean = jnp.sum(x, axis=-1, keepdims=True) * (1.0 / n)
    d = x - mean
    # torch.std default: unbiased (ddof = 1). Two-pass form for stability.
    inv_nm1 = 1.0 / (n - 1) if n > 1 else jnp.nan
    var = jnp.sum(d * d, axis=-1, keepdims=True) * inv_nm1
    std = jnp.sqrt(var)

    alpha = alpha_ref[0]
    bias = bias_ref[0]
    inv = pl.reciprocal(std + eps, approx=False)   # exact; one per row -> negligible
    scale = alpha * inv                            # (rows, 1)
    beta = bias - mean * scale                     # (rows, 1)
    # Re-read x for the epilogue instead of keeping `d` live across the reduction.
    o_ref[...] = (x * scale + beta).astype(o_ref.dtype)


def _layernorm_packed_kernel(alpha_ref, bias_ref, x_ref, o_ref, *, eps, hidden):
    """Packed path: each 128-wide VMEM row holds (128 // hidden) logical rows.

    Segment statistics are computed (already broadcast to every lane of the
    segment) by multiplying with a block-diagonal matrix of ones on the MXU,
    which is idle in this memory-bound kernel; all HBM traffic and elementwise
    work stays lane-dense.
    """
    x = x_ref[...].astype(jnp.float32)
    w = x.shape[-1]
    shift = int(math.log2(hidden))                 # hidden divides 128 -> power of two

    r = jax.lax.broadcasted_iota(jnp.int32, (w, w), 0)
    c = jax.lax.broadcasted_iota(jnp.int32, (w, w), 1)
    p = (jnp.right_shift(r, shift) == jnp.right_shift(c, shift)).astype(jnp.float32)

    # Per-lane broadcast of per-segment mean / unbiased variance (two-pass).
    mean = jnp.dot(x, p, preferred_element_type=jnp.float32) * (1.0 / hidden)
    d = x - mean
    var = jnp.dot(d * d, p, preferred_element_type=jnp.float32) * (1.0 / (hidden - 1))
    std = jnp.sqrt(var)

    alpha = alpha_ref[0]
    bias = bias_ref[0]
    inv = pl.reciprocal(std + eps, approx=False)
    scale = alpha * inv
    o_ref[...] = (x * scale + (bias - mean * scale)).astype(o_ref.dtype)


def _vmem_budget():
    """(tile_budget_bytes, vmem_limit_bytes) sized for the local TPU generation."""
    phys = 64 * 1024 * 1024                        # conservative default (v7x per-TC VMEM)
    try:
        phys = int(pltpu.get_tpu_info().vmem_capacity_bytes)
    except Exception:
        pass
    vmem_limit = min((phys * 3) // 4, 96 * 1024 * 1024)   # ~96 MiB v5e/v6e, ~48 MiB v7x
    return vmem_limit // 2, vmem_limit


def _min_grid_steps():
    """>= 4 grid steps on two-TensorCore chips (v7x) so each core's pipeline overlaps."""
    try:
        kind = jax.devices()[0].device_kind.lower()
        if "v7" in kind or "7x" in kind:
            return 4
    except Exception:
        pass
    return 1                                       # v5e / v6e: single TC, no forced split


def _choose_block_rows(prows, width, dtype):
    """Largest row tile whose double-buffered in/out + f32 temporaries fit the budget."""
    itemsize = jnp.dtype(dtype).itemsize
    align = 8 if itemsize >= 4 else 16
    wpad = max(width, pl.cdiv(width, 128) * 128)   # VMEM pads the lane dim to 128

    tile_budget, _ = _vmem_budget()
    # 2x(in) + 2x(out) buffers plus ~6 full-width f32 temporaries per row.
    per_row = wpad * (4 * itemsize + 6 * 4)
    br = (tile_budget // per_row) // align * align
    br = max(align, min(br, 16384))

    min_steps = _min_grid_steps()
    if min_steps > 1 and prows > min_steps * align:
        per_core = pl.cdiv(prows, min_steps) // align * align
        br = min(br, max(align, per_core))

    if br >= prows:
        return prows                               # single block; full dim is always legal
    return br                                      # multiple of `align`; last block may be ragged


@functools.partial(jax.jit, static_argnames=("eps", "block_rows"))
def layer_norm_block(x, alpha, bias, eps=1e-7, block_rows=None):
    """x: (..., hidden). alpha, bias: shape-(1,) scalar parameters."""
    orig_shape = x.shape
    hidden = orig_shape[-1]
    rows = math.prod(orig_shape[:-1])

    # Lane-dense packing: fold k = 128 // hidden logical rows into one 128-wide row
    # when hidden < 128 divides 128 and the row count cooperates (contiguous reshape
    # -> free). Keep the packed row count >= 8 so MXU tiles stay well-formed.
    pack = 1
    if 1 < hidden < 128 and 128 % hidden == 0:
        k = 128 // hidden
        if rows % k == 0 and rows // k >= 8:
            pack = k
    width = pack * hidden
    prows = rows // pack
    x2 = x.reshape(prows, width)

    if block_rows is None:
        block_rows = _choose_block_rows(prows, width, x.dtype)
    num_tiles = pl.cdiv(prows, block_rows)         # ragged last block handled by Pallas

    alpha = jnp.asarray(alpha, jnp.float32).reshape((1,))
    bias = jnp.asarray(bias, jnp.float32).reshape((1,))

    if pack > 1:
        kernel = functools.partial(_layernorm_packed_kernel, eps=eps, hidden=hidden)
    else:
        kernel = functools.partial(_layernorm_kernel, eps=eps)

    _, vmem_limit = _vmem_budget()

    out = pl.pallas_call(
        kernel,
        out_shape=jax.ShapeDtypeStruct((prows, width), x.dtype),
        grid_spec=pltpu.PrefetchScalarGridSpec(
            num_scalar_prefetch=0,
            grid=(num_tiles,),
            in_specs=[
                pl.BlockSpec(memory_space=pltpu.MemorySpace.SMEM),   # alpha (1,)
                pl.BlockSpec(memory_space=pltpu.MemorySpace.SMEM),   # bias  (1,)
                pl.BlockSpec((block_rows, width), lambda i: (i, 0)),
            ],
            out_specs=pl.BlockSpec((block_rows, width), lambda i: (i, 0)),
        ),
        compiler_params=pltpu.CompilerParams(
            dimension_semantics=("parallel",),
            vmem_limit_bytes=vmem_limit,
        ),
    )(alpha, bias, x2)

    return out.reshape(orig_shape)


if __name__ == "__main__":
    key = jax.random.PRNGKey(0)

    # Matches nn.Parameter(torch.ones(1)) / nn.Parameter(torch.zeros(1)).
    alpha = jnp.ones((1,), jnp.float32)
    bias = jnp.zeros((1,), jnp.float32)
    eps = 1e-7

    def reference(x):
        mean = jnp.mean(x, axis=-1, keepdims=True)
        std = jnp.std(x, axis=-1, keepdims=True, ddof=1)    # unbiased, like torch.std
        return alpha[0] * (x - mean) / (std + eps) + bias[0]

    # Main demo shape (hidden=32 -> lane-dense packed path: 4 logical rows / VMEM row).
    k1, k2 = jax.random.split(key)
    x = jax.random.normal(k1, (2, 16, 32), dtype=jnp.float32)
    out = jax.block_until_ready(layer_norm_block(x, alpha, bias, eps=eps))
    assert out.shape == x.shape
    assert jnp.allclose(out, reference(x), atol=1e-5, rtol=1e-5), "packed path mismatch"

    # Row count not divisible by the pack factor -> unpacked fallback path.
    x2 = jax.random.normal(k2, (3, 5, 32), dtype=jnp.float32)
    out2 = jax.block_until_ready(layer_norm_block(x2, alpha, bias, eps=eps))
    assert jnp.allclose(out2, reference(x2), atol=1e-5, rtol=1e-5), "fallback path mismatch"

    print("KERNEL_OK")
</pallas_src>

<mosaic_0001>
module attributes {stable_mosaic.version = 11 : i64} {
  func.func @_layernorm_packed_kernel(%arg0: i32, %arg1: memref<1xf32, #tpu.memory_space<smem>>, %arg2: memref<1xf32, #tpu.memory_space<smem>>, %arg3: memref<8x128xf32, #tpu.memory_space<vmem>>, %arg4: memref<8x128xf32, #tpu.memory_space<vmem>>) attributes {dimension_semantics = [#tpu.dimension_semantics<parallel>], iteration_bounds = array<i64: 1>, scalar_prefetch = 0 : i64, scratch_operands = 0 : i64, tpu.core_type = #tpu.core_type<tc>, window_params = [{transform_indices = @transform_0, window_bounds = array<i64: 1>}, {transform_indices = @transform_1, window_bounds = array<i64: 1>}, {transform_indices = @transform_2, window_bounds = array<i64: 8, 128>}, {transform_indices = @transform_3, window_bounds = array<i64: 8, 128>}]} {
    %c0 = arith.constant 0 : index
    %c0_0 = arith.constant 0 : index
    %0 = vector.load %arg3[%c0, %c0_0] : memref<8x128xf32, #tpu.memory_space<vmem>>, vector<8x128xf32>
    %1 = tpu.iota {dimensions = array<i32: 0>} : vector<128x128xi32>
    %2 = tpu.iota {dimensions = array<i32: 1>} : vector<128x128xi32>
    %c5_i32 = arith.constant 5 : i32
    %3 = vector.broadcast %c5_i32 : i32 to vector<128x128xi32>
    %4 = arith.shrsi %1, %3 : vector<128x128xi32>
    %c5_i32_1 = arith.constant 5 : i32
    %5 = vector.broadcast %c5_i32_1 : i32 to vector<128x128xi32>
    %6 = arith.shrsi %2, %5 : vector<128x128xi32>
    %7 = arith.cmpi eq, %4, %6 : vector<128x128xi32>
    %8 = arith.extui %7 : vector<128x128xi1> to vector<128x128xi32>
    %9 = arith.sitofp %8 : vector<128x128xi32> to vector<128x128xf32>
    %cst = arith.constant dense<0.000000e+00> : vector<8x128xf32>
    %10 = tpu.matmul %0, %9, %cst {dimension_numbers = #tpu.dot_dimension_numbers<[1], [0], [0], [1], [0, 0, 1, 1], [], []>} : vector<8x128xf32>, vector<128x128xf32>, vector<8x128xf32> -> vector<8x128xf32>
    %cst_2 = arith.constant 3.125000e-02 : f32
    %11 = vector.broadcast %cst_2 : f32 to vector<8x128xf32>
    %12 = arith.mulf %10, %11 : vector<8x128xf32>
    %13 = arith.subf %0, %12 : vector<8x128xf32>
    %14 = arith.mulf %13, %13 : vector<8x128xf32>
    %cst_3 = arith.constant dense<0.000000e+00> : vector<8x128xf32>
    %15 = tpu.matmul %14, %9, %cst_3 {dimension_numbers = #tpu.dot_dimension_numbers<[1], [0], [0], [1], [0, 0, 1, 1], [], []>} : vector<8x128xf32>, vector<128x128xf32>, vector<8x128xf32> -> vector<8x128xf32>
    %cst_4 = arith.constant 0.0322580636 : f32
    %16 = vector.broadcast %cst_4 : f32 to vector<8x128xf32>
    %17 = arith.mulf %15, %16 : vector<8x128xf32>
    %18 = math.sqrt %17 : vector<8x128xf32>
    %c0_5 = arith.constant 0 : index
    %19 = memref.load %arg1[%c0_5] : memref<1xf32, #tpu.memory_space<smem>>
    %c0_6 = arith.constant 0 : index
    %20 = memref.load %arg2[%c0_6] : memref<1xf32, #tpu.memory_space<smem>>
    %cst_7 = arith.constant 1.000000e-07 : f32
    %21 = vector.broadcast %cst_7 : f32 to vector<8x128xf32>
    %22 = arith.addf %18, %21 : vector<8x128xf32>
    %23 = tpu.reciprocal %22 : vector<8x128xf32> -> vector<8x128xf32>
    %24 = vector.broadcast %19 : f32 to vector<8x128xf32>
    %25 = arith.mulf %24, %23 : vector<8x128xf32>
    %26 = arith.mulf %0, %25 : vector<8x128xf32>
    %27 = arith.mulf %12, %25 : vector<8x128xf32>
    %28 = vector.broadcast %20 : f32 to vector<8x128xf32>
    %29 = arith.subf %28, %27 : vector<8x128xf32>
    %30 = arith.addf %26, %29 : vector<8x128xf32>
    %c0_8 = arith.constant 0 : index
    %c0_9 = arith.constant 0 : index
    %31 = vector.load %arg4[%c0_8, %c0_9] : memref<8x128xf32, #tpu.memory_space<vmem>>, vector<8x128xf32>
    tpu.vector_store %arg4[%c0_8, %c0_9], %30 {strides = array<i32>} : memref<8x128xf32, #tpu.memory_space<vmem>>, vector<8x128xf32>,
    return
  }
  func.func @transform_0(%arg0: i32) -> i32 {
    %c0_i32 = arith.constant 0 : i32
    %c0_i32_0 = arith.constant 0 : i32
    return %c0_i32 : i32
  }
  func.func @transform_1(%arg0: i32) -> i32 {
    %c0_i32 = arith.constant 0 : i32
    %c0_i32_0 = arith.constant 0 : i32
    return %c0_i32 : i32
  }
  func.func @transform_2(%arg0: i32) -> (i32, i32) {
    %c0_i32 = arith.constant 0 : i32
    %c0_i32_0 = arith.constant 0 : i32
    return %arg0, %c0_i32 : i32, i32
  }
  func.func @transform_3(%arg0: i32) -> (i32, i32) {
    %c0_i32 = arith.constant 0 : i32
    %c0_i32_0 = arith.constant 0 : i32
    return %arg0, %c0_i32 : i32, i32
  }
}

</mosaic_0001>

<bundles_post_ra>
// kernel: layer_norm_block.1
= control target key start
LH: loop header
LB: loop body
LE: loop exit
PB: predicated region body
PF: predicated region fallthrough
CT: control target
= control target key end

     0   :  { %v17_v0 = vlaneseq  ;;  %v239_v14 = vmov 1.0   ;;  %s340_s2 = inlined_call_operand.vmem [shape: f32[8,128], index: 2, kind: input, shape index: {}]   ;;  %s341_s0 = inlined_call_operand.<no memory space> [shape: f32[1], index: 0, kind: input, shape index: {}]   ;;  %s342_s1 = inlined_call_operand.<no memory space> [shape: f32[1], index: 1, kind: input, shape index: {}]   ;;  %s343_s3 = inlined_call_operand.vmem [shape: f32[8,128], index: 3, kind: output, shape index: {}]  }
   0x1   :  { %v16_v36 = vld [vmem:[%s340_s2] sm:$0xff]  ;;  %v174_v62 = vstv %s341_s0 }
   0x2   :  { %v260_v1 = vshrl.u32 %v17_v0, 7  ;;  %v35_v2 = vand.u32 127, %v17_v0 }
   0x4   :  { %v33_v3 = vadd.s32 120, %v260_v1  ;;  %v263_v4 = vshra.s32 %v35_v2, 5  ;;  %v32_v5 = vadd.s32 112, %v260_v1  ;;  %v31_v6 = vadd.s32 104, %v260_v1 }
   0x5   :  { %v30_v7 = vadd.s32 96, %v260_v1  ;;  %v29_v11 = vadd.s32 88, %v260_v1  ;;  %v28_v13 = vadd.s32 80, %v260_v1  ;;  %v27_v16 = vadd.s32 72, %v260_v1 }
   0x6   :  { %v51_v8 = vshra.s32 %v33_v3, 5  ;;  %v50_v9 = vshra.s32 %v32_v5, 5  ;;  %v49_v10 = vshra.s32 %v31_v6, 5  ;;  %v26_v18 = vadd.s32 64, %v260_v1 }
   0x7   :  { %v48_v12 = vshra.s32 %v30_v7, 5  ;;  %v47_v15 = vshra.s32 %v29_v11, 5  ;;  %v46_v17 = vshra.s32 %v28_v13, 5  ;;  %v45_v19 = vshra.s32 %v27_v16, 5 }
   0x8   :  { %vm68_vm0 = vcmp.eq.s32.totalorder %v51_v8, %v263_v4  ;;  %vm67_vm1 = vcmp.eq.s32.totalorder %v50_v9, %v263_v4  ;;  %vm66_vm2 = vcmp.eq.s32.totalorder %v49_v10, %v263_v4  ;;  %v25_v20 = vadd.s32 56, %v260_v1 }
   0x9   :  { %202 = vmatpush.msk.msra.mxu0 %vm68_vm0, %v239_v14  ;;  %218 = vmatpush.msk.msra.mxu1 %vm68_vm0, %v239_v14  ;;  %vm65_vm3 = vcmp.eq.s32.totalorder %v48_v12, %v263_v4  ;;  %vm64_vm4 = vcmp.eq.s32.totalorder %v47_v15, %v263_v4  ;;  %vm63_vm5 = vcmp.eq.s32.totalorder %v46_v17, %v263_v4  ;;  %v44_v21 = vshra.s32 %v26_v18, 5 }
   0xa   :  { %v24_v22 = vadd.s32 48, %v260_v1  ;;  %vm62_vm6 = vcmp.eq.s32.totalorder %v45_v19, %v263_v4  ;;  %v43_v23 = vshra.s32 %v25_v20, 5  ;;  %v23_v24 = vadd.s32 40, %v260_v1 }
   0xb   :  { %203 = vmatpush.msk.msra.mxu0 %vm67_vm1, %v239_v14  ;;  %219 = vmatpush.msk.msra.mxu1 %vm67_vm1, %v239_v14  ;;  %vm61_vm7 = vcmp.eq.s32.totalorder %v44_v21, %v263_v4  ;;  %v22_v26 = vadd.s32 32, %v260_v1  ;;  %v21_v28 = vadd.s32 24, %v260_v1  ;;  %v20_v30 = vadd.s32 16, %v260_v1 }
   0xc   :  { %v42_v25 = vshra.s32 %v24_v22, 5  ;;  %vm60_vm8 = vcmp.eq.s32.totalorder %v43_v23, %v263_v4  ;;  %v41_v27 = vshra.s32 %v23_v24, 5  ;;  %v19_v32 = vadd.s32 8, %v260_v1 }
   0xd   :  { %204 = vmatpush.msk.msra.mxu0 %vm66_vm2, %v239_v14  ;;  %220 = vmatpush.msk.msra.mxu1 %vm66_vm2, %v239_v14  ;;  %v40_v29 = vshra.s32 %v22_v26, 5  ;;  %v39_v31 = vshra.s32 %v21_v28, 5  ;;  %v38_v33 = vshra.s32 %v20_v30, 5  ;;  %v36_v35 = vshra.s32 %v260_v1, 5 }
   0xe   :  { %vm59_vm9 = vcmp.eq.s32.totalorder %v42_v25, %v263_v4  ;;  %vm58_vm10 = vcmp.eq.s32.totalorder %v41_v27, %v263_v4  ;;  %v37_v34 = vshra.s32 %v19_v32, 5  ;;  %v178_v2 = vstv %s342_s1 }
   0xf   :  { %205 = vmatpush.msk.msra.mxu0 %vm65_vm3, %v239_v14  ;;  %221 = vmatpush.msk.msra.mxu1 %vm65_vm3, %v239_v14  ;;  %vm57_vm11 = vcmp.eq.s32.totalorder %v40_v29, %v263_v4  ;;  %vm56_vm12 = vcmp.eq.s32.totalorder %v39_v31, %v263_v4  ;;  %vm55_vm13 = vcmp.eq.s32.totalorder %v38_v33, %v263_v4 }
  0x10   :  { %vm54_vm14 = vcmp.eq.s32.totalorder %v37_v34, %v263_v4  ;;  %vm53_vm15 = vcmp.eq.s32.totalorder %v36_v35, %v263_v4 }
  0x11   :  { %206 = vmatpush.msk.msra.mxu0 %vm64_vm4, %v239_v14  ;;  %222 = vmatpush.msk.msra.mxu1 %vm64_vm4, %v239_v14 }
  0x13   :  { %207 = vmatpush.msk.msra.mxu0 %vm63_vm5, %v239_v14  ;;  %223 = vmatpush.msk.msra.mxu1 %vm63_vm5, %v239_v14 }
  0x15   :  { %208 = vmatpush.msk.msra.mxu0 %vm62_vm6, %v239_v14  ;;  %224 = vmatpush.msk.msra.mxu1 %vm62_vm6, %v239_v14 }
  0x17   :  { %209 = vmatpush.msk.msra.mxu0 %vm61_vm7, %v239_v14  ;;  %225 = vmatpush.msk.msra.mxu1 %vm61_vm7, %v239_v14 }
  0x19   :  { %210 = vmatpush.msk.msra.mxu0 %vm60_vm8, %v239_v14  ;;  %226 = vmatpush.msk.msra.mxu1 %vm60_vm8, %v239_v14 }
  0x1b   :  { %211 = vmatpush.msk.msra.mxu0 %vm59_vm9, %v239_v14  ;;  %227 = vmatpush.msk.msra.mxu1 %vm59_vm9, %v239_v14 }
  0x1d   :  { %212 = vmatpush.msk.msra.mxu0 %vm58_vm10, %v239_v14  ;;  %228 = vmatpush.msk.msra.mxu1 %vm58_vm10, %v239_v14 }
  0x1f   :  { %213 = vmatpush.msk.msra.mxu0 %vm57_vm11, %v239_v14  ;;  %229 = vmatpush.msk.msra.mxu1 %vm57_vm11, %v239_v14 }
  0x21   :  { %214 = vmatpush.msk.msra.mxu0 %vm56_vm12, %v239_v14  ;;  %230 = vmatpush.msk.msra.mxu1 %vm56_vm12, %v239_v14 }
  0x23   :  { %215 = vmatpush.msk.msra.mxu0 %vm55_vm13, %v239_v14  ;;  %231 = vmatpush.msk.msra.mxu1 %vm55_vm13, %v239_v14 }
  0x25   :  { %216 = vmatpush.msk.msra.mxu0 %vm54_vm14, %v239_v14  ;;  %232 = vmatpush.msk.msra.mxu1 %vm54_vm14, %v239_v14 }
  0x27   :  { %217 = vmatpush.msk.msra.mxu0 %vm53_vm15, %v239_v14  ;;  %233 = vmatpush.msk.msra.mxu1 %vm53_vm15, %v239_v14 }
  0x28   :  { %117 = vmatmul.f32.vlgmr.msra.gmra.mxu0 %v16_v36 }
  0xa5   :  { %v118_v37 = vpop.f32.mrf.mxu0 }
  0xa6   :  { %v121_v38 = vmul.f32 0.03125, %v118_v37 }
  0xa8   :  { %v122_v39 = vsub.f32 %v16_v36, %v121_v38 }
  0xaa   :  { %v123_v40 = vmul.f32 %v122_v39, %v122_v39 }
  0xac   :  { %140 = vmatmul.f32.vlgmr.msra.gmra.mxu1 %v123_v40 }
 0x129   :  { %v141_v41 = vpop.f32.mrf.mxu1 }
 0x12a   :  { %v144_v42 = vmul.f32 0.032258064, %v141_v41 }
 0x12c   :  { %235 = vrsqrt.f32 %v144_v42  ;;  %vm152_vm0 = vcmp.eq.f32.partialorder %v144_v42, inf  ;;  %v155_v50 = vand.u32 2147483648, %v144_v42  ;;  %vm154_vm1 = vcmp.eq.f32.partialorder %v144_v42, 0.0 }
 0x132   :  { %v236_v43 = vpop.eup %235 }
 0x133   :  { %v146_v44 = vmul.f32 %v236_v43, %v144_v42 }
 0x135   :  { %v147_v45 = vmul.f32 %v236_v43, %v146_v44 }
 0x137   :  { %v148_v46 = vmul.f32 0.5, %v147_v45 }
 0x139   :  { %v149_v47 = vsub.f32 1.5, %v148_v46 }
 0x13b   :  { %v150_v48 = vmul.f32 %v236_v43, %v149_v47 }
 0x13d   :  { %v151_v49 = vmul.f32 %v150_v48, %v144_v42 }
 0x13f   :  { %v153_v51 = vsel %vm152_vm0, %v144_v42, %v151_v49 }
 0x140   :  { %v156_v52 = vsel %vm154_vm1, %v155_v50, %v153_v51 }
 0x141   :  { %v159_v53 = vadd.f32 1e-07, %v156_v52 }
 0x143   :  { %237 = vrcp.f32 %v159_v53  ;;  %v171_v57 = vand.u32 2147483648, %v159_v53  ;;  %v169_v59 = vand.u32 2147483647, %v159_v53  ;;  %vm165_vm3 = vweird.f32 %v159_v53 }
 0x145   :  { %v172_v61 = vor.u32 1.1754944e-38, %v171_v57  ;;  %vm170_vm5 = vcmp.eq.f32.partialorder %v169_v59, 8.507059e+37 }
 0x149   :  { %v238_v54 = vpop.eup %237 }
 0x14a   :  { %v161_v55 = vmul.f32 %v238_v54, %v159_v53  ;;  %vm166_vm2 = vweird.f32 %v238_v54 }
 0x14b   :  { %vm167_vm4 = vmor %vm165_vm3, %vm166_vm2 }
 0x14c   :  { %v162_v56 = vsub.f32 1.0, %v161_v55 }
 0x14e   :  { %v163_v58 = vmul.f32 %v238_v54, %v162_v56 }
 0x150   :  { %v164_v60 = vadd.f32 %v238_v54, %v163_v58 }
 0x152   :  { %v168_v63 = vsel %vm167_vm4, %v238_v54, %v164_v60 }
 0x153   :  { %v173_v0 = vsel %vm170_vm5, %v172_v61, %v168_v63 }
 0x154   :  { %v175_v1 = vmul.f32 %v174_v62, %v173_v0 }
 0x156   :  { %v177_v3 = vmul.f32 %v175_v1, %v121_v38  ;;  %v176_v4 = vmul.f32 %v175_v1, %v16_v36 }
 0x158   :  { %v179_v5 = vsub.f32 %v178_v2, %v177_v3 }
 0x15a   :  { %v180_v6 = vadd.f32 %v179_v5, %v176_v4 }
 0x15c   :  { %181 = vst [vmem:[%s343_s3] sm:$0xff] %v180_v6 }

</bundles_post_ra>
